<compile_context>
chip_gen: v7x
topology: tpu7x:2x2x1
jax: 0.10.0
libtpu: 0.0.40
codegen_flags: <defaults>
</compile_context>

<pallas_src>
import math

import jax
import jax.numpy as jnp
from jax.experimental import pallas as pl
from jax.experimental.pallas import tpu as pltpu


def _round_up(a, b):
    return ((a + b - 1) // b) * b


def _gelu_tanh(x):
    # tanh-approximate GELU.  tanh lowers to the EUP (its own VLIW slot), so it
    # is effectively free next to the MXU matmuls.  Max deviation from the
    # exact erf-GELU of torch.nn.GELU() is ~3e-3, well inside tolerance.
    c = math.sqrt(2.0 / math.pi)
    return 0.5 * x * (1.0 + jnp.tanh(c * (x + 0.044715 * (x * x * x))))


def net1_kernel(x_ref, w1_ref, b1_ref, w2_ref, b2_ref, o_ref):
    # One (large) batch tile of rows per grid step; weights/biases are resident
    # full blocks.  MXU inputs bf16, accumulation + elementwise math in f32.
    x = x_ref[...].astype(jnp.bfloat16)
    h = jnp.dot(x, w1_ref[...], preferred_element_type=jnp.float32) + b1_ref[...]
    h = _gelu_tanh(h)
    y = jnp.dot(h.astype(jnp.bfloat16), w2_ref[...],
                preferred_element_type=jnp.float32) + b2_ref[...]
    o_ref[...] = y.astype(o_ref.dtype)


def net1_forward(x, w1, b1, w2, b2, *, tile_m=512):
    """x: (B, num_ftrs); w1: (num_ftrs, x_fdim1); b1: (1, x_fdim1);
    w2: (x_fdim1, x_fdim2); b2: (1, x_fdim2) -> (B, x_fdim2)."""
    B, F = x.shape
    F1 = w1.shape[1]
    F2 = w2.shape[1]

    # Lane-dense layouts: pad hidden/output feature dims to multiples of 128 so
    # every store is a full-lane vst.  Zero padding is exact: gelu(0) = 0 and
    # zero rows/cols of W2 contribute nothing; we slice the real F2 back out.
    # (In real training the padded/bf16 weights would be prepared once.)
    F1p = _round_up(F1, 128)
    F2p = _round_up(F2, 128)
    w1p = jnp.pad(w1, ((0, 0), (0, F1p - F1))).astype(jnp.bfloat16)
    b1p = jnp.pad(b1, ((0, 0), (0, F1p - F1))).astype(jnp.float32)
    w2p = jnp.pad(w2, ((0, F1p - F1), (0, F2p - F2))).astype(jnp.bfloat16)
    b2p = jnp.pad(b2, ((0, 0), (0, F2p - F2))).astype(jnp.float32)

    # Large batch tiles: per-grid-step overhead is ~0.35 us, so take the biggest
    # tile the batch supports (capped at tile_m=512 so x/h/out tiles stay well
    # inside the v7x 64 MiB VMEM budget).  The B=16 demo runs in one grid step.
    tile_m = min(tile_m, _round_up(B, 8))
    grid = (pl.cdiv(B, tile_m),)

    def build(single_buffer_weights):
        # Weights/biases have a constant index_map (0, 0): single-buffer them so
        # they don't pay the default 2x VMEM double-buffering.
        const = (dict(pipeline_mode=pl.Buffered(1))
                 if single_buffer_weights else {})
        return pl.pallas_call(
            net1_kernel,
            out_shape=jax.ShapeDtypeStruct((B, F2p), x.dtype),
            grid_spec=pltpu.PrefetchScalarGridSpec(
                num_scalar_prefetch=0,
                grid=grid,
                in_specs=[
                    pl.BlockSpec((tile_m, F), lambda i: (i, 0)),          # x rows
                    pl.BlockSpec((F, F1p), lambda i: (0, 0), **const),    # W1
                    pl.BlockSpec((1, F1p), lambda i: (0, 0), **const),    # b1
                    pl.BlockSpec((F1p, F2p), lambda i: (0, 0), **const),  # W2
                    pl.BlockSpec((1, F2p), lambda i: (0, 0), **const),    # b2
                ],
                out_specs=pl.BlockSpec((tile_m, F2p), lambda i: (i, 0)),
            ),
            compiler_params=pltpu.CompilerParams(
                dimension_semantics=("parallel",)),
        )

    # TODO(synk): at large F*F1 (v7x has only 64 MiB VMEM) add a K-tiling grid
    # axis over F with an f32 VMEM accumulator + pl.when init/finalize instead
    # of keeping W1 fully resident, and an N-tiling axis over F2p once
    # tile_m*F1p no longer fits the vreg file.
    try:
        out = build(True)(x, w1p, b1p, w2p, b2p)
    except Exception:
        # Fallback for jax builds that reject single-buffered BlockSpecs.
        out = build(False)(x, w1p, b1p, w2p, b2p)
    return out[:, :F2]


def init_params(key, num_ftrs, x_fdim1, x_fdim2, dtype=jnp.float32):
    # Deterministic init mimicking nn.Linear's U(-1/sqrt(fan_in), 1/sqrt(fan_in)).
    k1, k2, k3, k4 = jax.random.split(key, 4)
    lim1 = 1.0 / math.sqrt(num_ftrs)
    lim2 = 1.0 / math.sqrt(x_fdim1)
    w1 = jax.random.uniform(k1, (num_ftrs, x_fdim1), dtype, -lim1, lim1)
    b1 = jax.random.uniform(k2, (1, x_fdim1), dtype, -lim1, lim1)
    w2 = jax.random.uniform(k3, (x_fdim1, x_fdim2), dtype, -lim2, lim2)
    b2 = jax.random.uniform(k4, (1, x_fdim2), dtype, -lim2, lim2)
    return w1, b1, w2, b2


if __name__ == "__main__":
    # Small shapes implied by the forward: flattened features in, two dense layers.
    B, NUM_FTRS, X_FDIM1, X_FDIM2 = 16, 32, 64, 16

    key = jax.random.PRNGKey(0)
    kx, kp = jax.random.split(key)
    x = jax.random.normal(kx, (B, NUM_FTRS), jnp.float32)
    w1, b1, w2, b2 = init_params(kp, NUM_FTRS, X_FDIM1, X_FDIM2)

    out = net1_forward(x, w1, b1, w2, b2)
    out = jax.block_until_ready(out)
    assert out.shape == (B, X_FDIM2) and out.dtype == jnp.float32

    # Reference check against the exact (f32, erf-GELU) torch-equivalent math.
    # Tolerance covers bf16 MXU inputs (~0.4% rel) + tanh-GELU approx (<3e-3).
    ref = jnp.dot(x, w1) + b1
    ref = jax.nn.gelu(ref, approximate=False)
    ref = jnp.dot(ref, w2) + b2
    assert jnp.allclose(out, ref, rtol=2e-2, atol=2e-2), "mismatch vs reference"

    print("KERNEL_OK")
</pallas_src>

<mosaic_0001>
module attributes {stable_mosaic.version = 11 : i64} {
  func.func @net1_kernel(%arg0: i32, %arg1: memref<16x32xf32, #tpu.memory_space<vmem>>, %arg2: memref<32x128xbf16, #tpu.memory_space<vmem>>, %arg3: memref<1x128xf32, #tpu.memory_space<vmem>>, %arg4: memref<128x128xbf16, #tpu.memory_space<vmem>>, %arg5: memref<1x128xf32, #tpu.memory_space<vmem>>, %arg6: memref<16x128xf32, #tpu.memory_space<vmem>>) attributes {dimension_semantics = [#tpu.dimension_semantics<parallel>], iteration_bounds = array<i64: 1>, scalar_prefetch = 0 : i64, scratch_operands = 0 : i64, tpu.core_type = #tpu.core_type<tc>, window_params = [{transform_indices = @transform_0, window_bounds = array<i64: 16, 32>}, {pipeline_mode = #tpu.pipeline_mode<synchronous>, transform_indices = @transform_1, window_bounds = array<i64: 32, 128>}, {pipeline_mode = #tpu.pipeline_mode<synchronous>, transform_indices = @transform_2, window_bounds = array<i64: 1, 128>}, {pipeline_mode = #tpu.pipeline_mode<synchronous>, transform_indices = @transform_3, window_bounds = array<i64: 128, 128>}, {pipeline_mode = #tpu.pipeline_mode<synchronous>, transform_indices = @transform_4, window_bounds = array<i64: 1, 128>}, {transform_indices = @transform_5, window_bounds = array<i64: 16, 128>}]} {
    %c0 = arith.constant 0 : index
    %c0_0 = arith.constant 0 : index
    %0 = vector.load %arg1[%c0, %c0_0] : memref<16x32xf32, #tpu.memory_space<vmem>>, vector<16x32xf32>
    %1 = arith.truncf %0 : vector<16x32xf32> to vector<16x32xbf16>
    %c0_1 = arith.constant 0 : index
    %c0_2 = arith.constant 0 : index
    %2 = vector.load %arg2[%c0_1, %c0_2] : memref<32x128xbf16, #tpu.memory_space<vmem>>, vector<32x128xbf16>
    %cst = arith.constant dense<0.000000e+00> : vector<16x128xf32>
    %3 = tpu.matmul %1, %2, %cst {dimension_numbers = #tpu.dot_dimension_numbers<[1], [0], [0], [1], [0, 0, 1, 1], [], []>} : vector<16x32xbf16>, vector<32x128xbf16>, vector<16x128xf32> -> vector<16x128xf32>
    %c0_3 = arith.constant 0 : index
    %c0_4 = arith.constant 0 : index
    %4 = vector.load %arg3[%c0_3, %c0_4] : memref<1x128xf32, #tpu.memory_space<vmem>>, vector<1x128xf32>
    %5 = vector.broadcast %4 : vector<1x128xf32> to vector<16x128xf32>
    %6 = arith.addf %3, %5 : vector<16x128xf32>
    %cst_5 = arith.constant 5.000000e-01 : f32
    %7 = vector.broadcast %cst_5 : f32 to vector<16x128xf32>
    %8 = arith.mulf %7, %6 : vector<16x128xf32>
    %9 = arith.mulf %6, %6 : vector<16x128xf32>
    %10 = arith.mulf %9, %6 : vector<16x128xf32>
    %cst_6 = arith.constant 4.471500e-02 : f32
    %11 = vector.broadcast %cst_6 : f32 to vector<16x128xf32>
    %12 = arith.mulf %11, %10 : vector<16x128xf32>
    %13 = arith.addf %6, %12 : vector<16x128xf32>
    %cst_7 = arith.constant 0.797884583 : f32
    %14 = vector.broadcast %cst_7 : f32 to vector<16x128xf32>
    %15 = arith.mulf %14, %13 : vector<16x128xf32>
    %16 = math.tanh %15 : vector<16x128xf32>
    %cst_8 = arith.constant 1.000000e+00 : f32
    %17 = vector.broadcast %cst_8 : f32 to vector<16x128xf32>
    %18 = arith.addf %17, %16 : vector<16x128xf32>
    %19 = arith.mulf %8, %18 : vector<16x128xf32>
    %20 = arith.truncf %19 : vector<16x128xf32> to vector<16x128xbf16>
    %c0_9 = arith.constant 0 : index
    %c0_10 = arith.constant 0 : index
    %21 = vector.load %arg4[%c0_9, %c0_10] : memref<128x128xbf16, #tpu.memory_space<vmem>>, vector<128x128xbf16>
    %cst_11 = arith.constant dense<0.000000e+00> : vector<16x128xf32>
    %22 = tpu.matmul %20, %21, %cst_11 {dimension_numbers = #tpu.dot_dimension_numbers<[1], [0], [0], [1], [0, 0, 1, 1], [], []>} : vector<16x128xbf16>, vector<128x128xbf16>, vector<16x128xf32> -> vector<16x128xf32>
    %c0_12 = arith.constant 0 : index
    %c0_13 = arith.constant 0 : index
    %23 = vector.load %arg5[%c0_12, %c0_13] : memref<1x128xf32, #tpu.memory_space<vmem>>, vector<1x128xf32>
    %24 = vector.broadcast %23 : vector<1x128xf32> to vector<16x128xf32>
    %25 = arith.addf %22, %24 : vector<16x128xf32>
    %c0_14 = arith.constant 0 : index
    %c0_15 = arith.constant 0 : index
    %26 = vector.load %arg6[%c0_14, %c0_15] : memref<16x128xf32, #tpu.memory_space<vmem>>, vector<16x128xf32>
    tpu.vector_store %arg6[%c0_14, %c0_15], %25 {strides = array<i32>} : memref<16x128xf32, #tpu.memory_space<vmem>>, vector<16x128xf32>,
    return
  }
  func.func @transform_0(%arg0: i32) -> (i32, i32) {
    %c0_i32 = arith.constant 0 : i32
    %c0_i32_0 = arith.constant 0 : i32
    return %arg0, %c0_i32 : i32, i32
  }
  func.func @transform_1(%arg0: i32) -> (i32, i32) {
    %c0_i32 = arith.constant 0 : i32
    %c0_i32_0 = arith.constant 0 : i32
    %c0_i32_1 = arith.constant 0 : i32
    return %c0_i32, %c0_i32_0 : i32, i32
  }
  func.func @transform_2(%arg0: i32) -> (i32, i32) {
    %c0_i32 = arith.constant 0 : i32
    %c0_i32_0 = arith.constant 0 : i32
    %c0_i32_1 = arith.constant 0 : i32
    return %c0_i32, %c0_i32_0 : i32, i32
  }
  func.func @transform_3(%arg0: i32) -> (i32, i32) {
    %c0_i32 = arith.constant 0 : i32
    %c0_i32_0 = arith.constant 0 : i32
    %c0_i32_1 = arith.constant 0 : i32
    return %c0_i32, %c0_i32_0 : i32, i32
  }
  func.func @transform_4(%arg0: i32) -> (i32, i32) {
    %c0_i32 = arith.constant 0 : i32
    %c0_i32_0 = arith.constant 0 : i32
    %c0_i32_1 = arith.constant 0 : i32
    return %c0_i32, %c0_i32_0 : i32, i32
  }
  func.func @transform_5(%arg0: i32) -> (i32, i32) {
    %c0_i32 = arith.constant 0 : i32
    %c0_i32_0 = arith.constant 0 : i32
    return %arg0, %c0_i32 : i32, i32
  }
}

module attributes {stable_mosaic.version = 11 : i64} {
  func.func @net1_kernel(%arg0: i32, %arg1: memref<16x32xf32, #tpu.memory_space<vmem>>, %arg2: memref<32x128xbf16, #tpu.memory_space<vmem>>, %arg3: memref<1x128xf32, #tpu.memory_space<vmem>>, %arg4: memref<128x128xbf16, #tpu.memory_space<vmem>>, %arg5: memref<1x128xf32, #tpu.memory_space<vmem>>, %arg6: memref<16x128xf32, #tpu.memory_space<vmem>>) attributes {dimension_semantics = [#tpu.dimension_semantics<parallel>], iteration_bounds = array<i64: 1>, scalar_prefetch = 0 : i64, scratch_operands = 0 : i64, tpu.core_type = #tpu.core_type<tc>, window_params = [{transform_indices = @transform_0, window_bounds = array<i64: 16, 32>}, {pipeline_mode = #tpu.pipeline_mode<synchronous>, transform_indices = @transform_1, window_bounds = array<i64: 32, 128>}, {pipeline_mode = #tpu.pipeline_mode<synchronous>, transform_indices = @transform_2, window_bounds = array<i64: 1, 128>}, {pipeline_mode = #tpu.pipeline_mode<synchronous>, transform_indices = @transform_3, window_bounds = array<i64: 128, 128>}, {pipeline_mode = #tpu.pipeline_mode<synchronous>, transform_indices = @transform_4, window_bounds = array<i64: 1, 128>}, {transform_indices = @transform_5, window_bounds = array<i64: 16, 128>}]} {
    %c0 = arith.constant 0 : index
    %c0_0 = arith.constant 0 : index
    %0 = vector.load %arg1[%c0, %c0_0] : memref<16x32xf32, #tpu.memory_space<vmem>>, vector<16x32xf32>
    %1 = arith.truncf %0 : vector<16x32xf32> to vector<16x32xbf16>
    %c0_1 = arith.constant 0 : index
    %c0_2 = arith.constant 0 : index
    %2 = vector.load %arg2[%c0_1, %c0_2] : memref<32x128xbf16, #tpu.memory_space<vmem>>, vector<32x128xbf16>
    %cst = arith.constant dense<0.000000e+00> : vector<16x128xf32>
    %3 = tpu.matmul %1, %2, %cst {dimension_numbers = #tpu.dot_dimension_numbers<[1], [0], [0], [1], [0, 0, 1, 1], [], []>} : vector<16x32xbf16>, vector<32x128xbf16>, vector<16x128xf32> -> vector<16x128xf32>
    %c0_3 = arith.constant 0 : index
    %c0_4 = arith.constant 0 : index
    %4 = vector.load %arg3[%c0_3, %c0_4] : memref<1x128xf32, #tpu.memory_space<vmem>>, vector<1x128xf32>
    %5 = vector.broadcast %4 : vector<1x128xf32> to vector<16x128xf32>
    %6 = arith.addf %3, %5 : vector<16x128xf32>
    %cst_5 = arith.constant 5.000000e-01 : f32
    %7 = vector.broadcast %cst_5 : f32 to vector<16x128xf32>
    %8 = arith.mulf %7, %6 : vector<16x128xf32>
    %9 = arith.mulf %6, %6 : vector<16x128xf32>
    %10 = arith.mulf %9, %6 : vector<16x128xf32>
    %cst_6 = arith.constant 4.471500e-02 : f32
    %11 = vector.broadcast %cst_6 : f32 to vector<16x128xf32>
    %12 = arith.mulf %11, %10 : vector<16x128xf32>
    %13 = arith.addf %6, %12 : vector<16x128xf32>
    %cst_7 = arith.constant 0.797884583 : f32
    %14 = vector.broadcast %cst_7 : f32 to vector<16x128xf32>
    %15 = arith.mulf %14, %13 : vector<16x128xf32>
    %16 = math.tanh %15 : vector<16x128xf32>
    %cst_8 = arith.constant 1.000000e+00 : f32
    %17 = vector.broadcast %cst_8 : f32 to vector<16x128xf32>
    %18 = arith.addf %17, %16 : vector<16x128xf32>
    %19 = arith.mulf %8, %18 : vector<16x128xf32>
    %20 = arith.truncf %19 : vector<16x128xf32> to vector<16x128xbf16>
    %c0_9 = arith.constant 0 : index
    %c0_10 = arith.constant 0 : index
    %21 = vector.load %arg4[%c0_9, %c0_10] : memref<128x128xbf16, #tpu.memory_space<vmem>>, vector<128x128xbf16>
    %cst_11 = arith.constant dense<0.000000e+00> : vector<16x128xf32>
    %22 = tpu.matmul %20, %21, %cst_11 {dimension_numbers = #tpu.dot_dimension_numbers<[1], [0], [0], [1], [0, 0, 1, 1], [], []>} : vector<16x128xbf16>, vector<128x128xbf16>, vector<16x128xf32> -> vector<16x128xf32>
    %c0_12 = arith.constant 0 : index
    %c0_13 = arith.constant 0 : index
    %23 = vector.load %arg5[%c0_12, %c0_13] : memref<1x128xf32, #tpu.memory_space<vmem>>, vector<1x128xf32>
    %24 = vector.broadcast %23 : vector<1x128xf32> to vector<16x128xf32>
    %25 = arith.addf %22, %24 : vector<16x128xf32>
    %c0_14 = arith.constant 0 : index
    %c0_15 = arith.constant 0 : index
    %26 = vector.load %arg6[%c0_14, %c0_15] : memref<16x128xf32, #tpu.memory_space<vmem>>, vector<16x128xf32>
    tpu.vector_store %arg6[%c0_14, %c0_15], %25 {strides = array<i32>} : memref<16x128xf32, #tpu.memory_space<vmem>>, vector<16x128xf32>,
    return
  }
  func.func @transform_0(%arg0: i32) -> (i32, i32) {
    %c0_i32 = arith.constant 0 : i32
    %c0_i32_0 = arith.constant 0 : i32
    return %arg0, %c0_i32 : i32, i32
  }
  func.func @transform_1(%arg0: i32) -> (i32, i32) {
    %c0_i32 = arith.constant 0 : i32
    %c0_i32_0 = arith.constant 0 : i32
    %c0_i32_1 = arith.constant 0 : i32
    return %c0_i32, %c0_i32_0 : i32, i32
  }
  func.func @transform_2(%arg0: i32) -> (i32, i32) {
    %c0_i32 = arith.constant 0 : i32
    %c0_i32_0 = arith.constant 0 : i32
    %c0_i32_1 = arith.constant 0 : i32
    return %c0_i32, %c0_i32_0 : i32, i32
  }
  func.func @transform_3(%arg0: i32) -> (i32, i32) {
    %c0_i32 = arith.constant 0 : i32
    %c0_i32_0 = arith.constant 0 : i32
    %c0_i32_1 = arith.constant 0 : i32
    return %c0_i32, %c0_i32_0 : i32, i32
  }
  func.func @transform_4(%arg0: i32) -> (i32, i32) {
    %c0_i32 = arith.constant 0 : i32
    %c0_i32_0 = arith.constant 0 : i32
    %c0_i32_1 = arith.constant 0 : i32
    return %c0_i32, %c0_i32_0 : i32, i32
  }
  func.func @transform_5(%arg0: i32) -> (i32, i32) {
    %c0_i32 = arith.constant 0 : i32
    %c0_i32_0 = arith.constant 0 : i32
    return %arg0, %c0_i32 : i32, i32
  }
}

</mosaic_0001>

<bundles_post_ra>
// kernel: tpu_custom_call.1
= control target key start
LH: loop header
LB: loop body
LE: loop exit
PB: predicated region body
PF: predicated region fallthrough
CT: control target
= control target key end

     0   :  { %10 = vsyncpa [#allocation3], 0  ;;  %s562_s0 = inlined_call_operand.hbm [shape: f32[16,32], index: 0, kind: input, shape index: {}]   ;;  %s563_s1 = inlined_call_operand.hbm [shape: bf16[32,128], index: 1, kind: input, shape index: {}]   ;;  %s564_s2 = inlined_call_operand.vmem [shape: f32[1,128], index: 2, kind: input, shape index: {}]   ;;  %s565_s3 = inlined_call_operand.hbm [shape: bf16[128,128], index: 3, kind: input, shape index: {}]   ;;  %s566_s4 = inlined_call_operand.vmem [shape: f32[1,128], index: 4, kind: input, shape index: {}]   ;;  %s567_s5 = inlined_call_operand.hbm [shape: f32[16,128], index: 5, kind: output, shape index: {}]  }
   0x1   :  { %11 = vsyncpa [#allocation6], 0 }
   0x2   :  { %12 = vsyncpa [#allocation4], 0  ;;  %s456_s18 = smov [#allocation5]   ;;  %s362_s22 = scalar_lea.hbm %s563_s1, 256 }
   0x3   :  { %s30_s19 = sshll.u32 %s456_s18, 4  ;;  %p363_p0 = scmp.ne.s32.totalorder %s563_s1, %s362_s22  ;;  %s31_s19 = int_to_ptr.vmem [resolvable:$true] %s30_s19 }
   0x4   :  { %p366_p1 = scmp.lt.u32.totalorder %s362_s22, %s563_s1 }
   0x6   :  { %p368_p2 = pnand %p366_p1, %p363_p0 }
   0x8   :  { %371 = shalt.err (!%p368_p2)
}
   0x9   :  { %s372_s27 = scalar_lea.vmem %s31_s19, 256  ;;  %p377_p4 = scmp.lt.s32.totalorder %s31_s19, %s31_s19 }
   0xa   :  { %p373_p3 = scmp.ne.s32.totalorder %s31_s19, %s372_s27  ;;  %p378_p5 = scmp.lt.s32.totalorder %s372_s27, %s372_s27 }
   0xc   :  { %p379_p6 = por %p378_p5, %p377_p4 }
   0xe   :  { %p380_p7 = pnand %p379_p6, %p373_p3 }
  0x10   :  { %383 = shalt.err (!%p380_p7)
}
  0x11   :  { %s457_s28 = smov 64   ;;  %s458_s29 = smov 4  }
  0x12   :  { %36 = dma.hbm_to_vmem [thread:$0]  %s563_s1, 256, %s31_s19, [#allocation6], %s457_s28, %s457_s28, %s458_s29  }
  0x13   :  { %s459_s7 = smov [#allocation2]   ;;  %s384_s11 = scalar_lea.hbm %s562_s0, 256 }
  0x14   :  { %s18_s8 = sshll.u32 %s459_s7, 4  ;;  %p385_p8 = scmp.ne.s32.totalorder %s562_s0, %s384_s11  ;;  %s19_s8 = int_to_ptr.vmem [resolvable:$true] %s18_s8 }
  0x15   :  { %p388_p9 = scmp.lt.u32.totalorder %s384_s11, %s562_s0 }
  0x17   :  { %p390_p10 = pnand %p388_p9, %p385_p8 }
  0x19   :  { %393 = shalt.err (!%p390_p10)
}
  0x1a   :  { %s394_s16 = scalar_lea.vmem %s19_s8, 256  ;;  %p399_p12 = scmp.lt.s32.totalorder %s19_s8, %s19_s8 }
  0x1b   :  { %p395_p11 = scmp.ne.s32.totalorder %s19_s8, %s394_s16  ;;  %p400_p13 = scmp.lt.s32.totalorder %s394_s16, %s394_s16 }
  0x1d   :  { %p401_p0 = por %p400_p13, %p399_p12 }
  0x1f   :  { %p402_p1 = pnand %p401_p0, %p395_p11 }
  0x21   :  { %405 = shalt.err (!%p402_p1)
}
  0x22   :  { %s460_s1 = smov 128   ;;  %s461_s17 = smov 8  }
  0x23   :  { %24 = dma.hbm_to_vmem [thread:$0]  %s562_s0, 256, %s19_s8, [#allocation3], %s460_s1, %s460_s1, %s461_s17  }
  0x24   :  { %s462_s20 = smov [#allocation7]   ;;  %s406_s24 = scalar_lea.hbm %s565_s3, 1024 }
  0x25   :  { %s44_s21 = sshll.u32 %s462_s20, 4  ;;  %p407_p2 = scmp.ne.s32.totalorder %s565_s3, %s406_s24  ;;  %s45_s21 = int_to_ptr.vmem [resolvable:$true] %s44_s21 }
  0x26   :  { %p410_p3 = scmp.lt.u32.totalorder %s406_s24, %s565_s3 }
  0x28   :  { %p412_p4 = pnand %p410_p3, %p407_p2 }
  0x2a   :  { %415 = shalt.err (!%p412_p4)
}
  0x2b   :  { %s416_s6 = scalar_lea.vmem %s45_s21, 1024  ;;  %p421_p6 = scmp.lt.s32.totalorder %s45_s21, %s45_s21 }
  0x2c   :  { %p417_p5 = scmp.ne.s32.totalorder %s45_s21, %s416_s6  ;;  %p422_p7 = scmp.lt.s32.totalorder %s416_s6, %s416_s6 }
  0x2e   :  { %p423_p8 = por %p422_p7, %p421_p6 }
  0x30   :  { %p424_p9 = pnand %p423_p8, %p417_p5 }
  0x32   :  { %427 = shalt.err (!%p424_p9)
}
  0x33   :  { %50 = dma.hbm_to_vmem [thread:$0]  %s565_s3, 1024, %s45_s21, [#allocation6], %s457_s28, %s457_s28, %s458_s29  }
  0x34   :  { %450 = dma.done.wait [#allocation3], 256  }
  0x35   :  { %451 = vsyncadd [#allocation3], 4294967040 }
  0x36   :  { %452 = dma.done.wait [#allocation6], 1280  }
  0x37   :  { %453 = vsyncadd [#allocation6], 4294966016  ;;  %v463_v0 = vmov 0.0   ;;  %vm464_vm0 = vmmov 0   ;;  %v348_v1 = vld [vmem:[#allocation5] sm:$0xff]   ;;  %v349_v2 = vld [vmem:[#allocation5 + $0x8] sm:$0xff]  }
  0x38   :  { %310 = vmatprep.subr.bf16.mxu0 %v463_v0  ;;  %314 = vmatprep.mubr.msk.bf16.mxu0 %vm464_vm0, %v463_v0  ;;  %v63_v3 = vld [vmem:[#allocation2] sm:$0xff]  ;;  %v64_v4 = vld [vmem:[#allocation2 + $0x8] sm:$0xff]  ;;  %vm89_vm1 = vcmask 261120   ;;  %v352_v8 = vld [vmem:[#allocation7 + $0x10] sm:$0xff]   ;;  %s465_s8 = smov [#allocation8]  }
  0x39   :  { %318 = vmatprep.subr.bf16.mxu1 %v463_v0  ;;  %334 = vmatprep.mubr.msk.bf16.mxu1 %vm464_vm0, %v463_v0  ;;  %v65_v5 = vpack.c.bf16 %v64_v4, %v63_v3  ;;  %v350_v6 = vld [vmem:[#allocation7] sm:$0xff]   ;;  %v351_v7 = vld [vmem:[#allocation7 + $0x8] sm:$0xff]   ;;  %v353_v9 = vld [vmem:[#allocation7 + $0x18] sm:$0xff]   ;;  %s272_s9 = sshll.u32 %s465_s8, 4  ;;  %s273_s9 = int_to_ptr.vmem [resolvable:$true] %s272_s9 }
  0x3a   :  { %311 = vmatpush3.bf16.msra.mxu0 %v348_v1  ;;  %319 = vmatpush3.bf16.msra.mxu1 %v350_v6  ;;  %v354_v10 = vld [vmem:[#allocation7 + $0x20] sm:$0xff]   ;;  %v355_v11 = vld [vmem:[#allocation7 + $0x28] sm:$0xff]   ;;  %v356_v12 = vld [vmem:[#allocation7 + $0x30] sm:$0xff]   ;;  %s428_s10 = scalar_lea.vmem %s273_s9, 256  ;;  %p433_p11 = scmp.lt.s32.totalorder %s273_s9, %s273_s9 }
  0x3b   :  { %312 = vmatprep.subr.bf16.mxu0 %v463_v0  ;;  %320 = vmatprep.subr.bf16.mxu1 %v463_v0  ;;  %v357_v13 = vld [vmem:[#allocation7 + $0x38] sm:$0xff]   ;;  %v285_v14 = vld [vmem:[%s564_s2] ss:$0 sm:$0xff]  ;;  %p429_p10 = scmp.ne.s32.totalorder %s273_s9, %s428_s10  ;;  %p434_p12 = scmp.lt.s32.totalorder %s428_s10, %s428_s10 }
  0x3c   :  { %v289_v40 = vld [vmem:[%s566_s4] ss:$0 sm:$0xff] }
  0x3d   :  { %p435_p13 = por %p434_p12, %p433_p11 }
  0x3e   :  { %313 = vmatpush3.bf16.msra.mxu0 %v349_v2  ;;  %321 = vmatpush3.bf16.msra.mxu1 %v351_v7 }
  0x3f   :  { %322 = vmatprep.subr.bf16.mxu1 %v463_v0  ;;  %p436_p0 = pnand %p435_p13, %p429_p10 }
  0x41   :  { %315 = vmatmul.mubr.msk.bf16.vlgmr.msra.gmra.mrb[0].mxu0 %vm89_vm1, %v65_v5 }
  0x42   :  { %323 = vmatpush3.bf16.msra.mxu1 %v352_v8 }
  0x43   :  { %324 = vmatprep.subr.bf16.mxu1 %v463_v0 }
  0x46   :  { %325 = vmatpush3.bf16.msra.mxu1 %v353_v9 }
  0x47   :  { %326 = vmatprep.subr.bf16.mxu1 %v463_v0 }
  0x4a   :  { %327 = vmatpush3.bf16.msra.mxu1 %v354_v10 }
  0x4b   :  { %328 = vmatprep.subr.bf16.mxu1 %v463_v0 }
  0x4e   :  { %329 = vmatpush3.bf16.msra.mxu1 %v355_v11 }
  0x4f   :  { %330 = vmatprep.subr.bf16.mxu1 %v463_v0 }
  0x52   :  { %331 = vmatpush3.bf16.msra.mxu1 %v356_v12 }
  0x53   :  { %332 = vmatprep.subr.bf16.mxu1 %v463_v0 }
  0x56   :  { %333 = vmatpush3.bf16.msra.mxu1 %v357_v13 }
 0x114   :  { %v127_v15 = vpop.f32.mrb[0].mxu0 }
 0x115   :  { %v128_v16 = vadd.f32 %v285_v14, %v127_v15  ;;  %v316_v17 = vpop.f32.mrb[1].mxu0 }
 0x116   :  { %v130_v18 = vpop.f32.mrb[2].mxu0 }
 0x117   :  { %v136_v19 = vmul.f32 %v128_v16, %v128_v16  ;;  %v131_v20 = vadd.f32 %v285_v14, %v130_v18  ;;  %v317_v21 = vpop.f32.mrb[3].mxu0  ;;  %v134_v34 = vmul.f32 0.5, %v128_v16 }
 0x119   :  { %v138_v22 = vmul.f32 %v136_v19, %v128_v16  ;;  %v137_v23 = vmul.f32 %v131_v20, %v131_v20  ;;  %v135_v35 = vmul.f32 0.5, %v131_v20 }
 0x11b   :  { %v140_v24 = vmul.f32 0.044715, %v138_v22  ;;  %v139_v25 = vmul.f32 %v137_v23, %v131_v20 }
 0x11d   :  { %v142_v26 = vadd.f32 %v140_v24, %v128_v16  ;;  %v141_v27 = vmul.f32 0.044715, %v139_v25 }
 0x11f   :  { %v144_v28 = vmul.f32 0.7978846, %v142_v26  ;;  %v143_v29 = vadd.f32 %v141_v27, %v131_v20 }
 0x121   :  { %358 = vtanh.f32 %v144_v28  ;;  %v145_v30 = vmul.f32 0.7978846, %v143_v29 }
 0x123   :  { %360 = vtanh.f32 %v145_v30 }
 0x12b   :  { %v359_v31 = vpop.eup %358 }
 0x12c   :  { %v148_v32 = vadd.f32 1.0, %v359_v31 }
 0x12d   :  { %v361_v33 = vpop.eup %360 }
 0x12e   :  { %v149_v36 = vadd.f32 1.0, %v361_v33  ;;  %v150_v37 = vmul.f32 %v148_v32, %v134_v34 }
 0x130   :  { %v151_v38 = vmul.f32 %v149_v36, %v135_v35 }
 0x132   :  { %v152_v39 = vpack.c.bf16 %v151_v38, %v150_v37 }
 0x134   :  { %335 = vmatmul.mubr.bf16.vlgmr.msra.gmra.mrb[0].mxu1 %v152_v39 }
 0x207   :  { %v258_v41 = vpop.f32.mrb[0].mxu1 }
 0x208   :  { %v259_v42 = vadd.f32 %v289_v40, %v258_v41  ;;  %v336_v43 = vpop.f32.mrb[1].mxu1 }
 0x209   :  { %v261_v44 = vpop.f32.mrb[2].mxu1 }
 0x20a   :  { %265 = vst [vmem:[#allocation8] sm:$0xff] %v259_v42  ;;  %v262_v45 = vadd.f32 %v289_v40, %v261_v44  ;;  %v337_v46 = vpop.f32.mrb[3].mxu1 }
 0x20c   :  { %266 = vst [vmem:[#allocation8 + $0x8] sm:$0xff] %v262_v45 }
 0x20d   :  { %439 = shalt.err (!%p436_p0)
}
 0x20e   :  { %s440_s12 = scalar_lea.hbm %s567_s5, 256 }
 0x20f   :  { %p441_p1 = scmp.ne.s32.totalorder %s567_s5, %s440_s12  ;;  %p444_p2 = scmp.lt.u32.totalorder %s440_s12, %s567_s5 }
 0x211   :  { %p446_p3 = pnand %p444_p2, %p441_p1 }
 0x213   :  { %449 = shalt.err (!%p446_p3)
}
 0x214   :  { %278 = dma.vmem_to_hbm [thread:$0]  %s273_s9, 256, %s567_s5, [#allocation4], %s460_s1, %s460_s1, %s461_s17  }
 0x215   :  { %454 = dma.done.wait [#allocation4], 256  }
 0x216   :  { %455 = vsyncadd [#allocation4], 4294967040 }
 0x217   :  { %282 = vsyncpa [#allocation3], 1 }
 0x218   :  { %283 = vsyncpa [#allocation6], 1 }
 0x219   :  { %284 = vsyncpa [#allocation4], 1 }

// kernel: tpu_custom_call.1
= control target key start
LH: loop header
LB: loop body
LE: loop exit
PB: predicated region body
PF: predicated region fallthrough
CT: control target
= control target key end

     0   :  { %10 = vsyncpa [#allocation3], 0  ;;  %s562_s0 = inlined_call_operand.hbm [shape: f32[16,32], index: 0, kind: input, shape index: {}]   ;;  %s563_s1 = inlined_call_operand.hbm [shape: bf16[32,128], index: 1, kind: input, shape index: {}]   ;;  %s564_s2 = inlined_call_operand.vmem [shape: f32[1,128], index: 2, kind: input, shape index: {}]   ;;  %s565_s3 = inlined_call_operand.hbm [shape: bf16[128,128], index: 3, kind: input, shape index: {}]   ;;  %s566_s4 = inlined_call_operand.vmem [shape: f32[1,128], index: 4, kind: input, shape index: {}]   ;;  %s567_s5 = inlined_call_operand.hbm [shape: f32[16,128], index: 5, kind: output, shape index: {}]  }
   0x1   :  { %11 = vsyncpa [#allocation6], 0 }
   0x2   :  { %12 = vsyncpa [#allocation4], 0  ;;  %s456_s18 = smov [#allocation5]   ;;  %s362_s22 = scalar_lea.hbm %s563_s1, 256 }
   0x3   :  { %s30_s19 = sshll.u32 %s456_s18, 4  ;;  %p363_p0 = scmp.ne.s32.totalorder %s563_s1, %s362_s22  ;;  %s31_s19 = int_to_ptr.vmem [resolvable:$true] %s30_s19 }
   0x4   :  { %p366_p1 = scmp.lt.u32.totalorder %s362_s22, %s563_s1 }
   0x6   :  { %p368_p2 = pnand %p366_p1, %p363_p0 }
   0x8   :  { %371 = shalt.err (!%p368_p2)
}
   0x9   :  { %s372_s27 = scalar_lea.vmem %s31_s19, 256  ;;  %p377_p4 = scmp.lt.s32.totalorder %s31_s19, %s31_s19 }
   0xa   :  { %p373_p3 = scmp.ne.s32.totalorder %s31_s19, %s372_s27  ;;  %p378_p5 = scmp.lt.s32.totalorder %s372_s27, %s372_s27 }
   0xc   :  { %p379_p6 = por %p378_p5, %p377_p4 }
   0xe   :  { %p380_p7 = pnand %p379_p6, %p373_p3 }
  0x10   :  { %383 = shalt.err (!%p380_p7)
}
  0x11   :  { %s457_s28 = smov 64   ;;  %s458_s29 = smov 4  }
  0x12   :  { %36 = dma.hbm_to_vmem [thread:$0]  %s563_s1, 256, %s31_s19, [#allocation6], %s457_s28, %s457_s28, %s458_s29  }
  0x13   :  { %s459_s7 = smov [#allocation2]   ;;  %s384_s11 = scalar_lea.hbm %s562_s0, 256 }
  0x14   :  { %s18_s8 = sshll.u32 %s459_s7, 4  ;;  %p385_p8 = scmp.ne.s32.totalorder %s562_s0, %s384_s11  ;;  %s19_s8 = int_to_ptr.vmem [resolvable:$true] %s18_s8 }
  0x15   :  { %p388_p9 = scmp.lt.u32.totalorder %s384_s11, %s562_s0 }
  0x17   :  { %p390_p10 = pnand %p388_p9, %p385_p8 }
  0x19   :  { %393 = shalt.err (!%p390_p10)
}
  0x1a   :  { %s394_s16 = scalar_lea.vmem %s19_s8, 256  ;;  %p399_p12 = scmp.lt.s32.totalorder %s19_s8, %s19_s8 }
  0x1b   :  { %p395_p11 = scmp.ne.s32.totalorder %s19_s8, %s394_s16  ;;  %p400_p13 = scmp.lt.s32.totalorder %s394_s16, %s394_s16 }
  0x1d   :  { %p401_p0 = por %p400_p13, %p399_p12 }
  0x1f   :  { %p402_p1 = pnand %p401_p0, %p395_p11 }
  0x21   :  { %405 = shalt.err (!%p402_p1)
}
  0x22   :  { %s460_s1 = smov 128   ;;  %s461_s17 = smov 8  }
  0x23   :  { %24 = dma.hbm_to_vmem [thread:$0]  %s562_s0, 256, %s19_s8, [#allocation3], %s460_s1, %s460_s1, %s461_s17  }
  0x24   :  { %s462_s20 = smov [#allocation7]   ;;  %s406_s24 = scalar_lea.hbm %s565_s3, 1024 }
  0x25   :  { %s44_s21 = sshll.u32 %s462_s20, 4  ;;  %p407_p2 = scmp.ne.s32.totalorder %s565_s3, %s406_s24  ;;  %s45_s21 = int_to_ptr.vmem [resolvable:$true] %s44_s21 }
  0x26   :  { %p410_p3 = scmp.lt.u32.totalorder %s406_s24, %s565_s3 }
  0x28   :  { %p412_p4 = pnand %p410_p3, %p407_p2 }
  0x2a   :  { %415 = shalt.err (!%p412_p4)
}
  0x2b   :  { %s416_s6 = scalar_lea.vmem %s45_s21, 1024  ;;  %p421_p6 = scmp.lt.s32.totalorder %s45_s21, %s45_s21 }
  0x2c   :  { %p417_p5 = scmp.ne.s32.totalorder %s45_s21, %s416_s6  ;;  %p422_p7 = scmp.lt.s32.totalorder %s416_s6, %s416_s6 }
  0x2e   :  { %p423_p8 = por %p422_p7, %p421_p6 }
  0x30   :  { %p424_p9 = pnand %p423_p8, %p417_p5 }
  0x32   :  { %427 = shalt.err (!%p424_p9)
}
  0x33   :  { %50 = dma.hbm_to_vmem [thread:$0]  %s565_s3, 1024, %s45_s21, [#allocation6], %s457_s28, %s457_s28, %s458_s29  }
  0x34   :  { %450 = dma.done.wait [#allocation3], 256  }
  0x35   :  { %451 = vsyncadd [#allocation3], 4294967040 }
  0x36   :  { %452 = dma.done.wait [#allocation6], 1280  }
  0x37   :  { %453 = vsyncadd [#allocation6], 4294966016  ;;  %v463_v0 = vmov 0.0   ;;  %vm464_vm0 = vmmov 0   ;;  %v348_v1 = vld [vmem:[#allocation5] sm:$0xff]   ;;  %v349_v2 = vld [vmem:[#allocation5 + $0x8] sm:$0xff]  }
  0x38   :  { %310 = vmatprep.subr.bf16.mxu0 %v463_v0  ;;  %314 = vmatprep.mubr.msk.bf16.mxu0 %vm464_vm0, %v463_v0  ;;  %v63_v3 = vld [vmem:[#allocation2] sm:$0xff]  ;;  %v64_v4 = vld [vmem:[#allocation2 + $0x8] sm:$0xff]  ;;  %vm89_vm1 = vcmask 261120   ;;  %v352_v8 = vld [vmem:[#allocation7 + $0x10] sm:$0xff]   ;;  %s465_s8 = smov [#allocation8]  }
  0x39   :  { %318 = vmatprep.subr.bf16.mxu1 %v463_v0  ;;  %334 = vmatprep.mubr.msk.bf16.mxu1 %vm464_vm0, %v463_v0  ;;  %v65_v5 = vpack.c.bf16 %v64_v4, %v63_v3  ;;  %v350_v6 = vld [vmem:[#allocation7] sm:$0xff]   ;;  %v351_v7 = vld [vmem:[#allocation7 + $0x8] sm:$0xff]   ;;  %v353_v9 = vld [vmem:[#allocation7 + $0x18] sm:$0xff]   ;;  %s272_s9 = sshll.u32 %s465_s8, 4  ;;  %s273_s9 = int_to_ptr.vmem [resolvable:$true] %s272_s9 }
  0x3a   :  { %311 = vmatpush3.bf16.msra.mxu0 %v348_v1  ;;  %319 = vmatpush3.bf16.msra.mxu1 %v350_v6  ;;  %v354_v10 = vld [vmem:[#allocation7 + $0x20] sm:$0xff]   ;;  %v355_v11 = vld [vmem:[#allocation7 + $0x28] sm:$0xff]   ;;  %v356_v12 = vld [vmem:[#allocation7 + $0x30] sm:$0xff]   ;;  %s428_s10 = scalar_lea.vmem %s273_s9, 256  ;;  %p433_p11 = scmp.lt.s32.totalorder %s273_s9, %s273_s9 }
  0x3b   :  { %312 = vmatprep.subr.bf16.mxu0 %v463_v0  ;;  %320 = vmatprep.subr.bf16.mxu1 %v463_v0  ;;  %v357_v13 = vld [vmem:[#allocation7 + $0x38] sm:$0xff]   ;;  %v285_v14 = vld [vmem:[%s564_s2] ss:$0 sm:$0xff]  ;;  %p429_p10 = scmp.ne.s32.totalorder %s273_s9, %s428_s10  ;;  %p434_p12 = scmp.lt.s32.totalorder %s428_s10, %s428_s10 }
  0x3c   :  { %v289_v40 = vld [vmem:[%s566_s4] ss:$0 sm:$0xff] }
  0x3d   :  { %p435_p13 = por %p434_p12, %p433_p11 }
  0x3e   :  { %313 = vmatpush3.bf16.msra.mxu0 %v349_v2  ;;  %321 = vmatpush3.bf16.msra.mxu1 %v351_v7 }
  0x3f   :  { %322 = vmatprep.subr.bf16.mxu1 %v463_v0  ;;  %p436_p0 = pnand %p435_p13, %p429_p10 }
  0x41   :  { %315 = vmatmul.mubr.msk.bf16.vlgmr.msra.gmra.mrb[0].mxu0 %vm89_vm1, %v65_v5 }
  0x42   :  { %323 = vmatpush3.bf16.msra.mxu1 %v352_v8 }
  0x43   :  { %324 = vmatprep.subr.bf16.mxu1 %v463_v0 }
  0x46   :  { %325 = vmatpush3.bf16.msra.mxu1 %v353_v9 }
  0x47   :  { %326 = vmatprep.subr.bf16.mxu1 %v463_v0 }
  0x4a   :  { %327 = vmatpush3.bf16.msra.mxu1 %v354_v10 }
  0x4b   :  { %328 = vmatprep.subr.bf16.mxu1 %v463_v0 }
  0x4e   :  { %329 = vmatpush3.bf16.msra.mxu1 %v355_v11 }
  0x4f   :  { %330 = vmatprep.subr.bf16.mxu1 %v463_v0 }
  0x52   :  { %331 = vmatpush3.bf16.msra.mxu1 %v356_v12 }
  0x53   :  { %332 = vmatprep.subr.bf16.mxu1 %v463_v0 }
  0x56   :  { %333 = vmatpush3.bf16.msra.mxu1 %v357_v13 }
 0x114   :  { %v127_v15 = vpop.f32.mrb[0].mxu0 }
 0x115   :  { %v128_v16 = vadd.f32 %v285_v14, %v127_v15  ;;  %v316_v17 = vpop.f32.mrb[1].mxu0 }
 0x116   :  { %v130_v18 = vpop.f32.mrb[2].mxu0 }
 0x117   :  { %v136_v19 = vmul.f32 %v128_v16, %v128_v16  ;;  %v131_v20 = vadd.f32 %v285_v14, %v130_v18  ;;  %v317_v21 = vpop.f32.mrb[3].mxu0  ;;  %v134_v34 = vmul.f32 0.5, %v128_v16 }
 0x119   :  { %v138_v22 = vmul.f32 %v136_v19, %v128_v16  ;;  %v137_v23 = vmul.f32 %v131_v20, %v131_v20  ;;  %v135_v35 = vmul.f32 0.5, %v131_v20 }
 0x11b   :  { %v140_v24 = vmul.f32 0.044715, %v138_v22  ;;  %v139_v25 = vmul.f32 %v137_v23, %v131_v20 }
 0x11d   :  { %v142_v26 = vadd.f32 %v140_v24, %v128_v16  ;;  %v141_v27 = vmul.f32 0.044715, %v139_v25 }
 0x11f   :  { %v144_v28 = vmul.f32 0.7978846, %v142_v26  ;;  %v143_v29 = vadd.f32 %v141_v27, %v131_v20 }
 0x121   :  { %358 = vtanh.f32 %v144_v28  ;;  %v145_v30 = vmul.f32 0.7978846, %v143_v29 }
 0x123   :  { %360 = vtanh.f32 %v145_v30 }
 0x12b   :  { %v359_v31 = vpop.eup %358 }
 0x12c   :  { %v148_v32 = vadd.f32 1.0, %v359_v31 }
 0x12d   :  { %v361_v33 = vpop.eup %360 }
 0x12e   :  { %v149_v36 = vadd.f32 1.0, %v361_v33  ;;  %v150_v37 = vmul.f32 %v148_v32, %v134_v34 }
 0x130   :  { %v151_v38 = vmul.f32 %v149_v36, %v135_v35 }
 0x132   :  { %v152_v39 = vpack.c.bf16 %v151_v38, %v150_v37 }
 0x134   :  { %335 = vmatmul.mubr.bf16.vlgmr.msra.gmra.mrb[0].mxu1 %v152_v39 }
 0x207   :  { %v258_v41 = vpop.f32.mrb[0].mxu1 }
 0x208   :  { %v259_v42 = vadd.f32 %v289_v40, %v258_v41  ;;  %v336_v43 = vpop.f32.mrb[1].mxu1 }
 0x209   :  { %v261_v44 = vpop.f32.mrb[2].mxu1 }
 0x20a   :  { %265 = vst [vmem:[#allocation8] sm:$0xff] %v259_v42  ;;  %v262_v45 = vadd.f32 %v289_v40, %v261_v44  ;;  %v337_v46 = vpop.f32.mrb[3].mxu1 }
 0x20c   :  { %266 = vst [vmem:[#allocation8 + $0x8] sm:$0xff] %v262_v45 }
 0x20d   :  { %439 = shalt.err (!%p436_p0)
}
 0x20e   :  { %s440_s12 = scalar_lea.hbm %s567_s5, 256 }
 0x20f   :  { %p441_p1 = scmp.ne.s32.totalorder %s567_s5, %s440_s12  ;;  %p444_p2 = scmp.lt.u32.totalorder %s440_s12, %s567_s5 }
 0x211   :  { %p446_p3 = pnand %p444_p2, %p441_p1 }
 0x213   :  { %449 = shalt.err (!%p446_p3)
}
 0x214   :  { %278 = dma.vmem_to_hbm [thread:$0]  %s273_s9, 256, %s567_s5, [#allocation4], %s460_s1, %s460_s1, %s461_s17  }
 0x215   :  { %454 = dma.done.wait [#allocation4], 256  }
 0x216   :  { %455 = vsyncadd [#allocation4], 4294967040 }
 0x217   :  { %282 = vsyncpa [#allocation3], 1 }
 0x218   :  { %283 = vsyncpa [#allocation6], 1 }
 0x219   :  { %284 = vsyncpa [#allocation4], 1 }

</bundles_post_ra>
